<compile_context>
chip_gen: v6e
topology: v6e:2x2x1
jax: 0.10.0
libtpu: 0.0.40
codegen_flags: <defaults>
</compile_context>

<pallas_src>
import functools
import math

import jax
import jax.numpy as jnp
from jax.experimental import pallas as pl
from jax.experimental.pallas import tpu as pltpu


def _round_up(a: int, b: int) -> int:
    return (a + b - 1) // b * b


def _mlp_kernel(x_ref, w1_ref, b1_ref, w2_ref, b2_ref, o_ref, acc_ref, *,
                approximate):
    """One (row-tile, hidden-chunk) grid step of the fused MLP."""
    k = pl.program_id(1)

    @pl.when(k == 0)
    def _():
        acc_ref[...] = jnp.zeros_like(acc_ref)

    # fc1 (this hidden chunk): MXU matmul in native param dtype, f32 accumulate.
    h = jnp.dot(x_ref[...], w1_ref[...], preferred_element_type=jnp.float32)
    h = h + b1_ref[...].astype(jnp.float32)

    # GELU (tanh approximation -> EUP slot); elementwise math stays in f32.
    h = jax.nn.gelu(h, approximate=approximate)
    # drop1 (p=0.0) is identity.

    # fc2 (this hidden chunk): back to param dtype for the MXU, f32 accumulate.
    h = h.astype(w2_ref.dtype)
    acc_ref[...] += jnp.dot(h, w2_ref[...], preferred_element_type=jnp.float32)

    @pl.when(k == pl.num_programs(1) - 1)
    def _():
        o = acc_ref[...] + b2_ref[...].astype(jnp.float32)
        o_ref[...] = o.astype(o_ref.dtype)
        # drop2 (p=0.0) is identity.


@functools.partial(jax.jit,
                   static_argnames=("tm", "approximate", "hidden_block"))
def mlp_pallas(x, w1, b1, w2, b2, *, tm=512, approximate=True,
               hidden_block=None):
    """Fused MLP: fc2(GELU(fc1(x))). x: (B, N, C_in) -> (B, N, C_out)."""
    B, N, c_in = x.shape
    hidden = w1.shape[1]
    c_out = w2.shape[1]
    M = B * N
    xb = jnp.dtype(x.dtype).itemsize
    wb = jnp.dtype(w1.dtype).itemsize

    # ---- channel packing: keep x loads and y stores lane-dense (128 lanes). --
    # Pack consecutive tokens along the channel axis in the wrapper (free,
    # contiguous reshape) and run the kernel on block-diagonal replicated
    # weights: no in-kernel relayout, no masked partial stores.
    pack = 1
    if c_out % 128 != 0:
        cand = math.lcm(c_out, 128) // c_out
        blockdiag_bytes = cand * cand * (c_in * hidden + hidden * c_out) * wb
        if cand * c_out <= 512 and blockdiag_bytes <= (8 << 20):
            pack = cand
    cin_p, cout_p, hid_p = pack * c_in, pack * c_out, pack * hidden

    # ---- hidden chunking: keep the live f32 intermediate (tm, th) small when
    # the weights are too large to sit resident in VMEM (large Swin widths). ---
    w_res_bytes = (cin_p * hid_p + hid_p * cout_p) * wb
    if hidden_block is not None:
        th = min(_round_up(hidden_block, 128), _round_up(hid_p, 128))
    elif w_res_bytes <= (12 << 20):
        th = hid_p                                   # single chunk, resident
    else:
        th = min(1024, _round_up(hid_p, 128))
    hid_pp = _round_up(hid_p, th)
    n_h = hid_pp // th
    resident = n_h == 1

    # ---- per-generation VMEM budget (v7x: 64 MiB physical per TensorCore). ---
    try:
        vmem_cap = int(pltpu.get_tpu_info().vmem_capacity_bytes)
    except Exception:
        vmem_cap = 64 << 20                          # conservative default
    budget = max(vmem_cap - (12 << 20), 16 << 20)    # headroom for the compiler

    if resident:        # single-buffered resident weights (pl.Buffered(1))
        w_bytes = (cin_p * hid_pp + hid_pp + hid_pp * cout_p + cout_p) * wb
    else:               # streaming, double-buffered hidden chunks
        w_bytes = 2 * (cin_p * th + th + th * cout_p) * wb + cout_p * wb

    # Bytes per token row: double-buffered x/y tiles, f32 accumulator, and f32
    # intermediates for the fc1 output + GELU temporaries.
    per_row = (2 * c_in + 2 * c_out) * xb + 4 * c_out + 4 * 4 * th // pack
    tm_budget = max((budget - w_bytes) // per_row, 8 * pack)

    # ---- row tiling: large tiles (HBM roofline), balanced last tile, and at
    # least two grid steps so both v7x TensorCores get work. -------------------
    row_align = 8 * pack
    tm_budget = max((tm_budget // row_align) * row_align, row_align)
    tm_req = max(min(tm, tm_budget), row_align)

    M_al = _round_up(M, row_align)
    n_min = 2 if M_al >= 2 * row_align else 1
    n_tiles = max(pl.cdiv(M_al, tm_req), n_min)
    tm_eff = _round_up(pl.cdiv(M_al, n_tiles), row_align)
    n_tiles = pl.cdiv(M_al, tm_eff)
    M_pad = n_tiles * tm_eff
    tm_rows = tm_eff // pack

    # ---- build the (packed) operands. ----------------------------------------
    x2d = x.reshape(M, c_in)
    if M_pad != M:
        x2d = jnp.pad(x2d, ((0, M_pad - M), (0, 0)))
    if pack > 1:
        eye = jnp.eye(pack, dtype=w1.dtype)
        w1p = jnp.kron(eye, w1)                      # (pack*C_in,  pack*hidden)
        w2p = jnp.kron(eye, w2)                      # (pack*hidden, pack*C_out)
        b1p = jnp.tile(b1, pack)
        b2p = jnp.tile(b2, pack)
        xp = x2d.reshape(M_pad // pack, cin_p)       # free, contiguous reshape
    else:
        w1p, w2p, b1p, b2p, xp = w1, w2, b1, b2, x2d
    if hid_pp != hid_p:                              # zero-pad hidden to n_h*th
        w1p = jnp.pad(w1p, ((0, 0), (0, hid_pp - hid_p)))
        b1p = jnp.pad(b1p, (0, hid_pp - hid_p))
        w2p = jnp.pad(w2p, ((0, hid_pp - hid_p), (0, 0)))
    b1p = b1p.reshape(1, hid_pp)
    b2p = b2p.reshape(1, cout_p)

    # ---- VMEM limit: actual footprint + margin, capped below physical VMEM. --
    est = (2 * tm_rows * cin_p * xb + 2 * tm_rows * cout_p * xb
           + tm_rows * cout_p * 4 + 4 * tm_rows * th * 4 + w_bytes)
    vmem_limit = int(min(max(est + (4 << 20), 32 << 20), budget))

    cost = pl.CostEstimate(
        flops=2 * M * (c_in * hidden + hidden * c_out),
        transcendentals=M * hidden,
        bytes_accessed=(xp.size * xb + (M_pad // pack) * cout_p * xb
                        + (w1p.size + w2p.size + b1p.size + b2p.size) * wb))

    # Resident (constant-index) operands do not need double buffering.
    if resident:
        def wspec(shape, imap):
            return pl.BlockSpec(shape, imap, pipeline_mode=pl.Buffered(1))
    else:
        def wspec(shape, imap):
            return pl.BlockSpec(shape, imap)

    kernel = functools.partial(_mlp_kernel, approximate=approximate)

    out_packed = pl.pallas_call(
        kernel,
        out_shape=jax.ShapeDtypeStruct((M_pad // pack, cout_p), x.dtype),
        grid_spec=pltpu.PrefetchScalarGridSpec(
            num_scalar_prefetch=0,
            grid=(n_tiles, n_h),                     # rows (parallel) x hidden
            in_specs=[
                pl.BlockSpec((tm_rows, cin_p), lambda i, k: (i, 0)),   # x tile
                wspec((cin_p, th), lambda i, k: (0, k)),               # W1
                wspec((1, th), lambda i, k: (0, k)),                   # b1
                wspec((th, cout_p), lambda i, k: (k, 0)),              # W2
                wspec((1, cout_p), lambda i, k: (0, 0)),               # b2
            ],
            out_specs=pl.BlockSpec((tm_rows, cout_p), lambda i, k: (i, 0)),
            scratch_shapes=[pltpu.VMEM((tm_rows, cout_p), jnp.float32)],
        ),
        compiler_params=pltpu.CompilerParams(
            dimension_semantics=("parallel", "arbitrary"),
            vmem_limit_bytes=vmem_limit),
        cost_estimate=cost,
    )(xp, w1p, b1p, w2p, b2p)

    out2d = out_packed.reshape(M_pad, c_out)[:M]
    return out2d.reshape(B, N, c_out)


def init_mlp_params(key, in_features, hidden_features, out_features,
                    dtype=jnp.float32):
    """Deterministic init mimicking nn.Linear (uniform +/- 1/sqrt(fan_in)).
    Weights stored as (in, out) so the kernel computes x @ W directly."""
    k1, k2, k3, k4 = jax.random.split(key, 4)
    lim1 = 1.0 / jnp.sqrt(in_features)
    lim2 = 1.0 / jnp.sqrt(hidden_features)
    w1 = jax.random.uniform(k1, (in_features, hidden_features),
                            minval=-lim1, maxval=lim1, dtype=dtype)
    b1 = jax.random.uniform(k2, (hidden_features,),
                            minval=-lim1, maxval=lim1, dtype=dtype)
    w2 = jax.random.uniform(k3, (hidden_features, out_features),
                            minval=-lim2, maxval=lim2, dtype=dtype)
    b2 = jax.random.uniform(k4, (out_features,),
                            minval=-lim2, maxval=lim2, dtype=dtype)
    return w1, b1, w2, b2


if __name__ == "__main__":
    # Small Swin-like shapes: batch=2, tokens=64 (8x8 window), C=32,
    # hidden = 4*C = 128 (mlp_ratio=4), out = C.
    B, N, C_IN = 2, 64, 32
    HIDDEN, C_OUT = 128, 32

    key = jax.random.PRNGKey(0)
    kx, kp = jax.random.split(key)
    x = jax.random.normal(kx, (B, N, C_IN), dtype=jnp.float32)
    w1, b1, w2, b2 = init_mlp_params(kp, C_IN, HIDDEN, C_OUT)

    ref_tanh = jax.nn.gelu(x @ w1 + b1, approximate=True) @ w2 + b2
    ref_erf = jax.nn.gelu(x @ w1 + b1, approximate=False) @ w2 + b2

    # 1) main path: packed small-C layout, resident single-buffered weights.
    out = jax.block_until_ready(mlp_pallas(x, w1, b1, w2, b2))
    assert out.shape == (B, N, C_OUT)
    assert jnp.allclose(out, ref_tanh, atol=1e-3, rtol=1e-3)
    # semantic check vs exact erf GELU (nn.GELU default) — loose tolerance.
    assert jnp.allclose(out, ref_erf, atol=2e-2, rtol=2e-2)

    # 2) forced hidden-dim chunking path (accumulator init/finalize via pl.when).
    out_c = jax.block_until_ready(
        mlp_pallas(x, w1, b1, w2, b2, hidden_block=128))
    assert jnp.allclose(out_c, ref_tanh, atol=1e-3, rtol=1e-3)

    # 3) pack=1 path (C_out a multiple of 128: lane-dense without packing).
    C2 = 128
    x_b = jax.random.normal(kx, (B, N, C2), dtype=jnp.float32)
    w1b, b1b, w2b, b2b = init_mlp_params(kp, C2, 2 * C2, C2)
    ref_b = jax.nn.gelu(x_b @ w1b + b1b, approximate=True) @ w2b + b2b
    out_b = jax.block_until_ready(mlp_pallas(x_b, w1b, b1b, w2b, b2b))
    assert jnp.allclose(out_b, ref_b, atol=2e-3, rtol=2e-3)

    # 4) bf16 params + activations (halves HBM traffic; f32 accumulation inside).
    bf = lambda t: t.astype(jnp.bfloat16)
    out_bf = jax.block_until_ready(
        mlp_pallas(bf(x), bf(w1), bf(b1), bf(w2), bf(b2)))
    assert out_bf.dtype == jnp.bfloat16
    assert jnp.allclose(out_bf.astype(jnp.float32), ref_tanh, atol=1e-1, rtol=1e-1)

    print("KERNEL_OK")
</pallas_src>

<mosaic_0001>
module attributes {stable_mosaic.version = 11 : i64} {
  func.func @_mlp_kernel(%arg0: i32, %arg1: i32, %arg2: memref<16x128xf32, #tpu.memory_space<vmem>>, %arg3: memref<128x512xf32, #tpu.memory_space<vmem>>, %arg4: memref<1x512xf32, #tpu.memory_space<vmem>>, %arg5: memref<512x128xf32, #tpu.memory_space<vmem>>, %arg6: memref<1x128xf32, #tpu.memory_space<vmem>>, %arg7: memref<16x128xf32, #tpu.memory_space<vmem>>, %arg8: memref<16x128xf32, #tpu.memory_space<vmem>>) attributes {dimension_semantics = [#tpu.dimension_semantics<parallel>, #tpu.dimension_semantics<arbitrary>], iteration_bounds = array<i64: 2, 1>, scalar_prefetch = 0 : i64, scratch_operands = 1 : i64, tpu.core_type = #tpu.core_type<tc>, window_params = [{transform_indices = @transform_0, window_bounds = array<i64: 16, 128>}, {pipeline_mode = #tpu.pipeline_mode<synchronous>, transform_indices = @transform_1, window_bounds = array<i64: 128, 512>}, {pipeline_mode = #tpu.pipeline_mode<synchronous>, transform_indices = @transform_2, window_bounds = array<i64: 1, 512>}, {pipeline_mode = #tpu.pipeline_mode<synchronous>, transform_indices = @transform_3, window_bounds = array<i64: 512, 128>}, {pipeline_mode = #tpu.pipeline_mode<synchronous>, transform_indices = @transform_4, window_bounds = array<i64: 1, 128>}, {transform_indices = @transform_5, window_bounds = array<i64: 16, 128>}]} {
    %c0_i32 = arith.constant 0 : i32
    %0 = arith.cmpi eq, %arg1, %c0_i32 : i32
    %1 = arith.extui %0 : i1 to i32
    %c0_i32_0 = arith.constant 0 : i32
    %2 = arith.cmpi ne, %1, %c0_i32_0 : i32
    scf.if %2 {
      %cst_19 = arith.constant 0.000000e+00 : f32
      %30 = vector.broadcast %cst_19 : f32 to vector<16x128xf32>
      %c0_20 = arith.constant 0 : index
      %c0_21 = arith.constant 0 : index
      %31 = vector.load %arg8[%c0_20, %c0_21] : memref<16x128xf32, #tpu.memory_space<vmem>>, vector<16x128xf32>
      tpu.vector_store %arg8[%c0_20, %c0_21], %30 {strides = array<i32>} : memref<16x128xf32, #tpu.memory_space<vmem>>, vector<16x128xf32>,
    } else {
    }
    %c0 = arith.constant 0 : index
    %c0_1 = arith.constant 0 : index
    %3 = vector.load %arg2[%c0, %c0_1] : memref<16x128xf32, #tpu.memory_space<vmem>>, vector<16x128xf32>
    %c0_2 = arith.constant 0 : index
    %c0_3 = arith.constant 0 : index
    %4 = vector.load %arg3[%c0_2, %c0_3] : memref<128x512xf32, #tpu.memory_space<vmem>>, vector<128x512xf32>
    %cst = arith.constant dense<0.000000e+00> : vector<16x512xf32>
    %5 = tpu.matmul %3, %4, %cst {dimension_numbers = #tpu.dot_dimension_numbers<[1], [0], [0], [1], [0, 0, 1, 1], [], []>} : vector<16x128xf32>, vector<128x512xf32>, vector<16x512xf32> -> vector<16x512xf32>
    %c0_4 = arith.constant 0 : index
    %c0_5 = arith.constant 0 : index
    %6 = vector.load %arg4[%c0_4, %c0_5] : memref<1x512xf32, #tpu.memory_space<vmem>>, vector<1x512xf32>
    %7 = vector.broadcast %6 : vector<1x512xf32> to vector<16x512xf32>
    %8 = arith.addf %5, %7 : vector<16x512xf32>
    %9 = arith.mulf %8, %8 : vector<16x512xf32>
    %10 = arith.mulf %8, %9 : vector<16x512xf32>
    %cst_6 = arith.constant 4.471500e-02 : f32
    %11 = vector.broadcast %cst_6 : f32 to vector<16x512xf32>
    %12 = arith.mulf %11, %10 : vector<16x512xf32>
    %13 = arith.addf %8, %12 : vector<16x512xf32>
    %cst_7 = arith.constant 0.797884583 : f32
    %14 = vector.broadcast %cst_7 : f32 to vector<16x512xf32>
    %15 = arith.mulf %14, %13 : vector<16x512xf32>
    %16 = math.tanh %15 : vector<16x512xf32>
    %cst_8 = arith.constant 1.000000e+00 : f32
    %17 = vector.broadcast %cst_8 : f32 to vector<16x512xf32>
    %18 = arith.addf %17, %16 : vector<16x512xf32>
    %cst_9 = arith.constant 5.000000e-01 : f32
    %19 = vector.broadcast %cst_9 : f32 to vector<16x512xf32>
    %20 = arith.mulf %19, %18 : vector<16x512xf32>
    %21 = arith.mulf %8, %20 : vector<16x512xf32>
    %c0_10 = arith.constant 0 : index
    %c0_11 = arith.constant 0 : index
    %22 = vector.load %arg8[%c0_10, %c0_11] : memref<16x128xf32, #tpu.memory_space<vmem>>, vector<16x128xf32>
    %c0_12 = arith.constant 0 : index
    %c0_13 = arith.constant 0 : index
    %23 = vector.load %arg5[%c0_12, %c0_13] : memref<512x128xf32, #tpu.memory_space<vmem>>, vector<512x128xf32>
    %cst_14 = arith.constant dense<0.000000e+00> : vector<16x128xf32>
    %24 = tpu.matmul %21, %23, %cst_14 {dimension_numbers = #tpu.dot_dimension_numbers<[1], [0], [0], [1], [0, 0, 1, 1], [], []>} : vector<16x512xf32>, vector<512x128xf32>, vector<16x128xf32> -> vector<16x128xf32>
    %25 = arith.addf %22, %24 : vector<16x128xf32>
    %c0_15 = arith.constant 0 : index
    %c0_16 = arith.constant 0 : index
    %26 = vector.load %arg8[%c0_15, %c0_16] : memref<16x128xf32, #tpu.memory_space<vmem>>, vector<16x128xf32>
    tpu.vector_store %arg8[%c0_15, %c0_16], %25 {strides = array<i32>} : memref<16x128xf32, #tpu.memory_space<vmem>>, vector<16x128xf32>,
    %c0_i32_17 = arith.constant 0 : i32
    %27 = arith.cmpi eq, %arg1, %c0_i32_17 : i32
    %28 = arith.extui %27 : i1 to i32
    %c0_i32_18 = arith.constant 0 : i32
    %29 = arith.cmpi ne, %28, %c0_i32_18 : i32
    scf.if %29 {
      %c0_19 = arith.constant 0 : index
      %c0_20 = arith.constant 0 : index
      %30 = vector.load %arg8[%c0_19, %c0_20] : memref<16x128xf32, #tpu.memory_space<vmem>>, vector<16x128xf32>
      %c0_21 = arith.constant 0 : index
      %c0_22 = arith.constant 0 : index
      %31 = vector.load %arg6[%c0_21, %c0_22] : memref<1x128xf32, #tpu.memory_space<vmem>>, vector<1x128xf32>
      %32 = vector.broadcast %31 : vector<1x128xf32> to vector<16x128xf32>
      %33 = arith.addf %30, %32 : vector<16x128xf32>
      %c0_23 = arith.constant 0 : index
      %c0_24 = arith.constant 0 : index
      %34 = vector.load %arg7[%c0_23, %c0_24] : memref<16x128xf32, #tpu.memory_space<vmem>>, vector<16x128xf32>
      tpu.vector_store %arg7[%c0_23, %c0_24], %33 {strides = array<i32>} : memref<16x128xf32, #tpu.memory_space<vmem>>, vector<16x128xf32>,
    } else {
    }
    return
  }
  func.func @transform_0(%arg0: i32, %arg1: i32) -> (i32, i32) {
    %c0_i32 = arith.constant 0 : i32
    %c0_i32_0 = arith.constant 0 : i32
    return %arg0, %c0_i32 : i32, i32
  }
  func.func @transform_1(%arg0: i32, %arg1: i32) -> (i32, i32) {
    %c0_i32 = arith.constant 0 : i32
    %c0_i32_0 = arith.constant 0 : i32
    return %c0_i32, %arg1 : i32, i32
  }
  func.func @transform_2(%arg0: i32, %arg1: i32) -> (i32, i32) {
    %c0_i32 = arith.constant 0 : i32
    %c0_i32_0 = arith.constant 0 : i32
    return %c0_i32, %arg1 : i32, i32
  }
  func.func @transform_3(%arg0: i32, %arg1: i32) -> (i32, i32) {
    %c0_i32 = arith.constant 0 : i32
    %c0_i32_0 = arith.constant 0 : i32
    return %arg1, %c0_i32 : i32, i32
  }
  func.func @transform_4(%arg0: i32, %arg1: i32) -> (i32, i32) {
    %c0_i32 = arith.constant 0 : i32
    %c0_i32_0 = arith.constant 0 : i32
    %c0_i32_1 = arith.constant 0 : i32
    return %c0_i32, %c0_i32_0 : i32, i32
  }
  func.func @transform_5(%arg0: i32, %arg1: i32) -> (i32, i32) {
    %c0_i32 = arith.constant 0 : i32
    %c0_i32_0 = arith.constant 0 : i32
    return %arg0, %c0_i32 : i32, i32
  }
}

</mosaic_0001>

<bundles_post_ra>
// kernel: tile.17
= control target key start
LH: loop header
LB: loop body
LE: loop exit
PB: predicated region body
PF: predicated region fallthrough
CT: control target
= control target key end

     0   :  { %s22_s0 = inlined_call_operand.vmem [shape: f32[32], index: 0, kind: input, shape index: {}]   ;;  %s23_s1 = inlined_call_operand.vmem [shape: f32[4,32], index: 1, kind: output, shape index: {}]  }
   0x1   :  { %v4_v0 = vld [vmem:[%s22_s0] ss:$0 sm:$0xff] }
   0x2   :  { %5 = vst [vmem:[%s23_s1] sm:$0xf] %v4_v0 }

// kernel: tile.19
= control target key start
LH: loop header
LB: loop body
LE: loop exit
PB: predicated region body
PF: predicated region fallthrough
CT: control target
= control target key end

     0   :  { %vm8_vm0 = vcmask 261120   ;;  %s40_s8 = smov 32   ;;  %s41_s9 = smov 64   ;;  %vm14_vm1 = vcmask 1048320   ;;  %vm20_vm2 = vcmask 785920   ;;  %vm26_vm3 = vcmask 523520   ;;  %s58_s0 = inlined_call_operand.vmem [shape: f32[4,32], index: 0, kind: input, shape index: {}]   ;;  %s59_s1 = inlined_call_operand.vmem [shape: f32[1,128], index: 1, kind: output, shape index: {}]  }
   0x1   :  { %v5_v0 = vld [vmem:[%s58_s0] sm:$0xf]  ;;  %s39_s0 = smov 96  }
   0x2   :  { %6 = vst [vmem:[#allocation1] sm:$0xf] %v5_v0 }
   0x9   :  { %v11_v1 = vld [vmem:[#allocation1 + $0x3] sm:$0x1]   ;;  %v23_v2 = vld [vmem:[#allocation1 + $0x1] sm:$0x1]   ;;  %v7_v3 = vld [vmem:[#allocation1] sm:$0x1]  }
   0xa   :  { %12 = vrot.lane.b32.xlu0 %v11_v1, %s39_s0  ;;  %24 = vrot.lane.b32.xlu1 %v23_v2, %s40_s8  ;;  %v17_v4 = vld [vmem:[#allocation1 + $0x2] sm:$0x1]   ;;  %9 = vst.msk [vmem:[#allocation0] sm:$0x1] %vm8_vm0, %v7_v3  }
   0xe   :  { %18 = vrot.lane.b32.xlu0 %v17_v4, %s41_s9 }
  0x7c   :  { %v13_v5 = vpop.permute.xlu0 %12   ;;  %v25_v6 = vpop.permute.xlu1 %24  }
  0x7d   :  { %15 = vst.msk [vmem:[#allocation0] sm:$0x1] %vm14_vm1, %v13_v5  }
  0x80   :  { %v19_v7 = vpop.permute.xlu0 %18  }
  0x81   :  { %21 = vst.msk [vmem:[#allocation0] sm:$0x1] %vm20_vm2, %v19_v7  }
  0x82   :  { %27 = vst.msk [vmem:[#allocation0] sm:$0x1] %vm26_vm3, %v25_v6  }
  0x89   :  { %v32_v8 = vld [vmem:[#allocation0] sm:$0x1] }
  0x8a   :  { %35 = vst [vmem:[%s59_s1] sm:$0x1] %v32_v8 }

// kernel: tile.13
= control target key start
LH: loop header
LB: loop body
LE: loop exit
PB: predicated region body
PF: predicated region fallthrough
CT: control target
= control target key end

     0   :  { %s22_s0 = inlined_call_operand.vmem [shape: f32[128], index: 0, kind: input, shape index: {}]   ;;  %s23_s1 = inlined_call_operand.vmem [shape: f32[4,128], index: 1, kind: output, shape index: {}]  }
   0x1   :  { %v4_v0 = vld [vmem:[%s22_s0] ss:$0 sm:$0xff] }
   0x2   :  { %5 = vst [vmem:[%s23_s1] sm:$0xf] %v4_v0 }

// kernel: mlp_pallas.1
= control target key start
LH: loop header
LB: loop body
LE: loop exit
PB: predicated region body
PF: predicated region fallthrough
CT: control target
= control target key end

     0   :  { %s1153_s18 = smov 0   ;;  %s1155_s19 = smov 0   ;;  %s1652_s0 = inlined_call_operand.vmem [shape: f32[32,128], index: 0, kind: input, shape index: {}]   ;;  %s1653_s1 = inlined_call_operand.vmem [shape: f32[128,512], index: 1, kind: input, shape index: {}]   ;;  %s1654_s2 = inlined_call_operand.vmem [shape: f32[1,512], index: 2, kind: input, shape index: {}]   ;;  %s1655_s3 = inlined_call_operand.vmem [shape: f32[512,128], index: 3, kind: input, shape index: {}]   ;;  %s1656_s4 = inlined_call_operand.vmem [shape: f32[1,128], index: 4, kind: input, shape index: {}]   ;;  %s1657_s5 = inlined_call_operand.vmem [shape: f32[32,128], index: 5, kind: output, shape index: {}]  }
   0x1   :  { %s1157_s20 = smov 0  }
   0x2 LB: > { %s27_s21 = sadd.s32 1, %s1116_s19  ;;  %p973_p0 = scmp.ge.s32.totalorder %s1120_s20, 1  ;;  %s1120_s20 = sphi %s1157_s20, %s15_s20   ;;  %s1116_s19 = sphi %s1155_s19, %s1660_s19   ;;  %s1112_s18 = sphi %s1153_s18, %s1659_s18  }
   0x3   : > { %p29_p1 = scmp.ge.s32.totalorder %s27_s21, 2  ;;  %p232_p2 = scmp.lt.s32.totalorder %s1120_s20, 3 }
   0x5   : > { %s1662_s21 = smov (%p29_p1, %s27_s21), 0  ;;  %p233_p3 = pnand %p973_p0, %p232_p2 }
   0x6   : > { %s974_s27 = sshll.u32 (!%p233_p3), %s1112_s18, 1 }
   0x7   : > { %236 = sbr.rel (%p233_p3) target bundleno = 482 (0x1e2), region = 40  ;;  %p1296_p4 = scmp.lt.s32.totalorder (!%p233_p3), %s974_s27, 3 }
   0xc   : > { %v372_v0 = vld [vmem:[%s1653_s1 + $0x1e8] sm:$0xff]  ;;  %v374_v1 = vld [vmem:[%s1653_s1 + $0x1f8] sm:$0xff]  ;;  %v371_v2 = vld [vmem:[%s1653_s1 + $0x1e0] sm:$0xff]  ;;  %s1664_s27 = smov (!%p1296_p4, %s974_s27), 3 }
   0xd   : > { %397 = vmatprep.subr.mxu0 %v372_v0  ;;  %474 = vmatprep.subr.mxu1 %v374_v1  ;;  %v373_v3 = vld [vmem:[%s1653_s1 + $0x1f0] sm:$0xff]  ;;  %v368_v4 = vld [vmem:[%s1653_s1 + $0x1c8] sm:$0xff]  ;;  %v370_v5 = vld [vmem:[%s1653_s1 + $0x1d8] sm:$0xff]  ;;  %s975_s7 = sshll.u32 %s1664_s27, 3  ;;  %v1122_v1 = vmov 0.0  }
   0xe   : > { %398 = vmatpush1.msra.mxu0 %v371_v2  ;;  %475 = vmatpush1.msra.mxu1 %v373_v3  ;;  %v367_v6 = vld [vmem:[%s1653_s1 + $0x1c0] sm:$0xff]  ;;  %v369_v7 = vld [vmem:[%s1653_s1 + $0x1d0] sm:$0xff]  ;;  %v364_v8 = vld [vmem:[%s1653_s1 + $0x1a8] sm:$0xff]  ;;  %s278_s25 = scalar_lea.vmem %s1652_s0, %s975_s7  ;;  %s301_s24 = scalar_lea.vmem %s1657_s5, %s975_s7 }
   0xf   : > { %399 = vmatprep.subr.mxu0 %v368_v4  ;;  %476 = vmatprep.subr.mxu1 %v370_v5  ;;  %v366_v9 = vld [vmem:[%s1653_s1 + $0x1b8] sm:$0xff]  ;;  %v363_v10 = vld [vmem:[%s1653_s1 + $0x1a0] sm:$0xff]  ;;  %v365_v11 = vld [vmem:[%s1653_s1 + $0x1b0] sm:$0xff] }
  0x10   : > { %400 = vmatpush1.msra.mxu0 %v367_v6  ;;  %477 = vmatpush1.msra.mxu1 %v369_v7  ;;  %v360_v12 = vld [vmem:[%s1653_s1 + $0x188] sm:$0xff]  ;;  %v362_v13 = vld [vmem:[%s1653_s1 + $0x198] sm:$0xff]  ;;  %v359_v14 = vld [vmem:[%s1653_s1 + $0x180] sm:$0xff] }
  0x11   : > { %401 = vmatprep.subr.mxu0 %v364_v8  ;;  %478 = vmatprep.subr.mxu1 %v366_v9  ;;  %v361_v15 = vld [vmem:[%s1653_s1 + $0x190] sm:$0xff]  ;;  %v356_v16 = vld [vmem:[%s1653_s1 + $0x168] sm:$0xff]  ;;  %v358_v17 = vld [vmem:[%s1653_s1 + $0x178] sm:$0xff] }
  0x12   : > { %402 = vmatpush1.msra.mxu0 %v363_v10  ;;  %479 = vmatpush1.msra.mxu1 %v365_v11  ;;  %v355_v18 = vld [vmem:[%s1653_s1 + $0x160] sm:$0xff]  ;;  %v357_v19 = vld [vmem:[%s1653_s1 + $0x170] sm:$0xff]  ;;  %v352_v20 = vld [vmem:[%s1653_s1 + $0x148] sm:$0xff] }
  0x13   : > { %403 = vmatprep.subr.mxu0 %v360_v12  ;;  %480 = vmatprep.subr.mxu1 %v362_v13  ;;  %v354_v21 = vld [vmem:[%s1653_s1 + $0x158] sm:$0xff]  ;;  %v351_v22 = vld [vmem:[%s1653_s1 + $0x140] sm:$0xff]  ;;  %v353_v23 = vld [vmem:[%s1653_s1 + $0x150] sm:$0xff] }
  0x14   : > { %404 = vmatpush1.msra.mxu0 %v359_v14  ;;  %481 = vmatpush1.msra.mxu1 %v361_v15  ;;  %v348_v24 = vld [vmem:[%s1653_s1 + $0x128] sm:$0xff]  ;;  %v350_v25 = vld [vmem:[%s1653_s1 + $0x138] sm:$0xff]  ;;  %v347_v26 = vld [vmem:[%s1653_s1 + $0x120] sm:$0xff] }
  0x15   : > { %405 = vmatprep.subr.mxu0 %v356_v16  ;;  %482 = vmatprep.subr.mxu1 %v358_v17  ;;  %v349_v27 = vld [vmem:[%s1653_s1 + $0x130] sm:$0xff]  ;;  %v344_v28 = vld [vmem:[%s1653_s1 + $0x108] sm:$0xff]  ;;  %v346_v29 = vld [vmem:[%s1653_s1 + $0x118] sm:$0xff] }
  0x16   : > { %406 = vmatpush1.msra.mxu0 %v355_v18  ;;  %483 = vmatpush1.msra.mxu1 %v357_v19  ;;  %v343_v30 = vld [vmem:[%s1653_s1 + $0x100] sm:$0xff]  ;;  %v345_v31 = vld [vmem:[%s1653_s1 + $0x110] sm:$0xff]  ;;  %v340_v32 = vld [vmem:[%s1653_s1 + $0xe8] sm:$0xff] }
  0x17   : > { %407 = vmatprep.subr.mxu0 %v352_v20  ;;  %484 = vmatprep.subr.mxu1 %v354_v21  ;;  %v342_v33 = vld [vmem:[%s1653_s1 + $0xf8] sm:$0xff]  ;;  %v339_v34 = vld [vmem:[%s1653_s1 + $0xe0] sm:$0xff]  ;;  %v341_v35 = vld [vmem:[%s1653_s1 + $0xf0] sm:$0xff] }
  0x18   : > { %408 = vmatpush1.msra.mxu0 %v351_v22  ;;  %485 = vmatpush1.msra.mxu1 %v353_v23  ;;  %v336_v36 = vld [vmem:[%s1653_s1 + $0xc8] sm:$0xff]  ;;  %v338_v37 = vld [vmem:[%s1653_s1 + $0xd8] sm:$0xff]  ;;  %v335_v38 = vld [vmem:[%s1653_s1 + $0xc0] sm:$0xff] }
  0x19   : > { %409 = vmatprep.subr.mxu0 %v348_v24  ;;  %486 = vmatprep.subr.mxu1 %v350_v25  ;;  %v337_v39 = vld [vmem:[%s1653_s1 + $0xd0] sm:$0xff]  ;;  %v332_v40 = vld [vmem:[%s1653_s1 + $0xa8] sm:$0xff]  ;;  %v334_v41 = vld [vmem:[%s1653_s1 + $0xb8] sm:$0xff] }
  0x1a   : > { %410 = vmatpush1.msra.mxu0 %v347_v26  ;;  %487 = vmatpush1.msra.mxu1 %v349_v27  ;;  %v331_v42 = vld [vmem:[%s1653_s1 + $0xa0] sm:$0xff]  ;;  %v333_v43 = vld [vmem:[%s1653_s1 + $0xb0] sm:$0xff]  ;;  %v328_v44 = vld [vmem:[%s1653_s1 + $0x88] sm:$0xff] }
  0x1b   : > { %411 = vmatprep.subr.mxu0 %v344_v28  ;;  %488 = vmatprep.subr.mxu1 %v346_v29  ;;  %v330_v45 = vld [vmem:[%s1653_s1 + $0x98] sm:$0xff]  ;;  %v327_v46 = vld [vmem:[%s1653_s1 + $0x80] sm:$0xff]  ;;  %v329_v47 = vld [vmem:[%s1653_s1 + $0x90] sm:$0xff] }
  0x1c   : > { %412 = vmatpush1.msra.mxu0 %v343_v30  ;;  %489 = vmatpush1.msra.mxu1 %v345_v31  ;;  %v324_v48 = vld [vmem:[%s1653_s1 + $0x68] sm:$0xff]  ;;  %v326_v49 = vld [vmem:[%s1653_s1 + $0x78] sm:$0xff]  ;;  %v323_v50 = vld [vmem:[%s1653_s1 + $0x60] sm:$0xff] }
  0x1d   : > { %413 = vmatprep.subr.mxu0 %v340_v32  ;;  %490 = vmatprep.subr.mxu1 %v342_v33  ;;  %v325_v51 = vld [vmem:[%s1653_s1 + $0x70] sm:$0xff]  ;;  %v320_v52 = vld [vmem:[%s1653_s1 + $0x48] sm:$0xff]  ;;  %v322_v53 = vld [vmem:[%s1653_s1 + $0x58] sm:$0xff] }
  0x1e   : > { %414 = vmatpush1.msra.mxu0 %v339_v34  ;;  %491 = vmatpush1.msra.mxu1 %v341_v35  ;;  %v319_v54 = vld [vmem:[%s1653_s1 + $0x40] sm:$0xff]  ;;  %v321_v55 = vld [vmem:[%s1653_s1 + $0x50] sm:$0xff]  ;;  %v316_v56 = vld [vmem:[%s1653_s1 + $0x28] sm:$0xff] }
  0x1f   : > { %415 = vmatprep.subr.mxu0 %v336_v36  ;;  %492 = vmatprep.subr.mxu1 %v338_v37  ;;  %v318_v57 = vld [vmem:[%s1653_s1 + $0x38] sm:$0xff]  ;;  %v315_v58 = vld [vmem:[%s1653_s1 + $0x20] sm:$0xff]  ;;  %v317_v59 = vld [vmem:[%s1653_s1 + $0x30] sm:$0xff] }
  0x20   : > { %416 = vmatpush1.msra.mxu0 %v335_v38  ;;  %493 = vmatpush1.msra.mxu1 %v337_v39  ;;  %v312_v60 = vld [vmem:[%s1653_s1 + $0x8] sm:$0xff]  ;;  %v314_v61 = vld [vmem:[%s1653_s1 + $0x18] sm:$0xff]  ;;  %v311_v62 = vld [vmem:[%s1653_s1] sm:$0xff] }
  0x21   : > { %417 = vmatprep.subr.mxu0 %v332_v40  ;;  %494 = vmatprep.subr.mxu1 %v334_v41  ;;  %v313_v63 = vld [vmem:[%s1653_s1 + $0x10] sm:$0xff]  ;;  %v309_v0 = vld [vmem:[%s278_s25] sm:$0xff]  ;;  %v310_v2 = vld [vmem:[%s278_s25 + $0x8] sm:$0xff] }
  0x22   : > { %418 = vmatpush1.msra.mxu0 %v331_v42  ;;  %495 = vmatpush1.msra.mxu1 %v333_v43  ;;  %v656_v3 = vld [vmem:[%s1655_s3 + $0xf8] sm:$0xff]  ;;  %v655_v7 = vld [vmem:[%s1655_s3 + $0xf0] sm:$0xff]  ;;  %v654_v11 = vld [vmem:[%s1655_s3 + $0xe8] sm:$0xff] }
  0x23   : > { %419 = vmatprep.subr.mxu0 %v328_v44  ;;  %496 = vmatprep.subr.mxu1 %v330_v45  ;;  %v688_v4 = vld [vmem:[%s1655_s3 + $0x1f8] sm:$0xff]  ;;  %v687_v8 = vld [vmem:[%s1655_s3 + $0x1f0] sm:$0xff]  ;;  %v686_v12 = vld [vmem:[%s1655_s3 + $0x1e8] sm:$0xff] }
  0x24   : > { %420 = vmatpush1.msra.mxu0 %v327_v46  ;;  %497 = vmatpush1.msra.mxu1 %v329_v47  ;;  %v640_v5 = vld [vmem:[%s1655_s3 + $0x78] sm:$0xff]  ;;  %v639_v9 = vld [vmem:[%s1655_s3 + $0x70] sm:$0xff]  ;;  %v638_v13 = vld [vmem:[%s1655_s3 + $0x68] sm:$0xff] }
  0x25   : > { %421 = vmatprep.subr.mxu0 %v324_v48  ;;  %498 = vmatprep.subr.mxu1 %v326_v49  ;;  %v672_v6 = vld [vmem:[%s1655_s3 + $0x178] sm:$0xff]  ;;  %v671_v10 = vld [vmem:[%s1655_s3 + $0x170] sm:$0xff]  ;;  %v670_v14 = vld [vmem:[%s1655_s3 + $0x168] sm:$0xff] }
  0x26   : > { %422 = vmatpush1.msra.mxu0 %v323_v50  ;;  %499 = vmatpush1.msra.mxu1 %v325_v51  ;;  %v653_v15 = vld [vmem:[%s1655_s3 + $0xe0] sm:$0xff]  ;;  %v652_v19 = vld [vmem:[%s1655_s3 + $0xd8] sm:$0xff]  ;;  %v651_v23 = vld [vmem:[%s1655_s3 + $0xd0] sm:$0xff] }
  0x27   : > { %423 = vmatprep.subr.mxu0 %v320_v52  ;;  %500 = vmatprep.subr.mxu1 %v322_v53  ;;  %v685_v16 = vld [vmem:[%s1655_s3 + $0x1e0] sm:$0xff]  ;;  %v684_v20 = vld [vmem:[%s1655_s3 + $0x1d8] sm:$0xff]  ;;  %v683_v24 = vld [vmem:[%s1655_s3 + $0x1d0] sm:$0xff] }
  0x28   : > { %424 = vmatpush1.msra.mxu0 %v319_v54  ;;  %501 = vmatpush1.msra.mxu1 %v321_v55  ;;  %v637_v17 = vld [vmem:[%s1655_s3 + $0x60] sm:$0xff]  ;;  %v636_v21 = vld [vmem:[%s1655_s3 + $0x58] sm:$0xff]  ;;  %v635_v25 = vld [vmem:[%s1655_s3 + $0x50] sm:$0xff] }
  0x29   : > { %425 = vmatprep.subr.mxu0 %v316_v56  ;;  %502 = vmatprep.subr.mxu1 %v318_v57  ;;  %v669_v18 = vld [vmem:[%s1655_s3 + $0x160] sm:$0xff]  ;;  %v668_v22 = vld [vmem:[%s1655_s3 + $0x158] sm:$0xff]  ;;  %v667_v26 = vld [vmem:[%s1655_s3 + $0x150] sm:$0xff] }
  0x2a   : > { %426 = vmatpush1.msra.mxu0 %v315_v58  ;;  %503 = vmatpush1.msra.mxu1 %v317_v59  ;;  %v650_v27 = vld [vmem:[%s1655_s3 + $0xc8] sm:$0xff]  ;;  %v649_v31 = vld [vmem:[%s1655_s3 + $0xc0] sm:$0xff]  ;;  %v648_v35 = vld [vmem:[%s1655_s3 + $0xb8] sm:$0xff] }
  0x2b   : > { %427 = vmatprep.subr.mxu0 %v312_v60  ;;  %504 = vmatprep.subr.mxu1 %v314_v61  ;;  %v682_v28 = vld [vmem:[%s1655_s3 + $0x1c8] sm:$0xff]  ;;  %v681_v32 = vld [vmem:[%s1655_s3 + $0x1c0] sm:$0xff]  ;;  %v680_v36 = vld [vmem:[%s1655_s3 + $0x1b8] sm:$0xff] }
  0x2c   : > { %428 = vmatpush1.msra.mxu0 %v311_v62  ;;  %461 = vmatprep.mubr.f32.mxu0 %v1122_v1  ;;  %v634_v29 = vld [vmem:[%s1655_s3 + $0x48] sm:$0xff]  ;;  %v633_v33 = vld [vmem:[%s1655_s3 + $0x40] sm:$0xff]  ;;  %v632_v37 = vld [vmem:[%s1655_s3 + $0x38] sm:$0xff] }
  0x2d   : > { %505 = vmatpush1.msra.mxu1 %v313_v63  ;;  %538 = vmatprep.mubr.f32.mxu1 %v1122_v1  ;;  %v666_v30 = vld [vmem:[%s1655_s3 + $0x148] sm:$0xff]  ;;  %v665_v34 = vld [vmem:[%s1655_s3 + $0x140] sm:$0xff]  ;;  %v664_v38 = vld [vmem:[%s1655_s3 + $0x138] sm:$0xff] }
  0x2e   : > { %462 = vmatmul.mubr.f32.vlgmr.msra.gmra.mxu0 %v309_v0  ;;  %539 = vmatmul.mubr.f32.vlgmr.msra.gmra.mxu1 %v309_v0  ;;  %v647_v39 = vld [vmem:[%s1655_s3 + $0xb0] sm:$0xff]  ;;  %v646_v43 = vld [vmem:[%s1655_s3 + $0xa8] sm:$0xff]  ;;  %v645_v47 = vld [vmem:[%s1655_s3 + $0xa0] sm:$0xff] }
  0x2f   : > { %467 = vmatprep.mubr.f32.mxu0 %v1122_v1  ;;  %544 = vmatprep.mubr.f32.mxu1 %v1122_v1  ;;  %v679_v40 = vld [vmem:[%s1655_s3 + $0x1b0] sm:$0xff]  ;;  %v678_v44 = vld [vmem:[%s1655_s3 + $0x1a8] sm:$0xff]  ;;  %v677_v48 = vld [vmem:[%s1655_s3 + $0x1a0] sm:$0xff] }
  0x30   : > { %981 = vmatprep.subr.mxu0 %v656_v3  ;;  %1019 = vmatprep.subr.mxu1 %v688_v4  ;;  %v631_v41 = vld [vmem:[%s1655_s3 + $0x30] sm:$0xff]  ;;  %v630_v45 = vld [vmem:[%s1655_s3 + $0x28] sm:$0xff]  ;;  %v629_v49 = vld [vmem:[%s1655_s3 + $0x20] sm:$0xff]  ;;  %v377_v3 = vlaneseq }
  0x31   : > { %982 = vmatpush3.msra.mxu0 %v640_v5  ;;  %1020 = vmatpush3.msra.mxu1 %v672_v6  ;;  %v663_v42 = vld [vmem:[%s1655_s3 + $0x130] sm:$0xff]  ;;  %v662_v46 = vld [vmem:[%s1655_s3 + $0x128] sm:$0xff]  ;;  %v661_v50 = vld [vmem:[%s1655_s3 + $0x120] sm:$0xff] }
  0x32   : > { %468 = vmatmul.mubr.f32.gmra.mxu0 %v310_v2  ;;  %545 = vmatmul.mubr.f32.gmra.mxu1 %v310_v2  ;;  %v644_v51 = vld [vmem:[%s1655_s3 + $0x98] sm:$0xff]  ;;  %v643_v55 = vld [vmem:[%s1655_s3 + $0x90] sm:$0xff]  ;;  %v642_v59 = vld [vmem:[%s1655_s3 + $0x88] sm:$0xff]  ;;  %v378_v4 = vshrl.u32 %v377_v3, 7 }
  0x33   : > { %983 = vmatprep.subr.mxu0 %v655_v7  ;;  %1021 = vmatprep.subr.mxu1 %v687_v8  ;;  %v676_v52 = vld [vmem:[%s1655_s3 + $0x198] sm:$0xff]  ;;  %v675_v56 = vld [vmem:[%s1655_s3 + $0x190] sm:$0xff]  ;;  %v674_v60 = vld [vmem:[%s1655_s3 + $0x188] sm:$0xff] }
  0x34   : > { %984 = vmatpush3.msra.mxu0 %v639_v9  ;;  %1022 = vmatpush3.msra.mxu1 %v671_v10  ;;  %v628_v53 = vld [vmem:[%s1655_s3 + $0x18] sm:$0xff]  ;;  %v627_v57 = vld [vmem:[%s1655_s3 + $0x10] sm:$0xff]  ;;  %v626_v61 = vld [vmem:[%s1655_s3 + $0x8] sm:$0xff]  ;;  %v379_v5 = vsub.s32 0, %v378_v4  ;;  %v387_v6 = vsub.s32 2, %v378_v4  ;;  %v383_v8 = vsub.s32 1, %v378_v4 }
  0x35   : > { %985 = vmatprep.subr.mxu0 %v654_v11  ;;  %1023 = vmatprep.subr.mxu1 %v686_v12  ;;  %v660_v54 = vld [vmem:[%s1655_s3 + $0x118] sm:$0xff]  ;;  %v659_v58 = vld [vmem:[%s1655_s3 + $0x110] sm:$0xff]  ;;  %v658_v62 = vld [vmem:[%s1655_s3 + $0x108] sm:$0xff]  ;;  %v391_v9 = vsub.s32 3, %v378_v4 }
  0x36   : > { %986 = vmatpush3.msra.mxu0 %v638_v13  ;;  %1024 = vmatpush3.msra.mxu1 %v670_v14  ;;  %v641_v63 = vld [vmem:[%s1655_s3 + $0x80] sm:$0xff] }
  0x37   : > { %987 = vmatprep.subr.mxu0 %v653_v15  ;;  %1025 = vmatprep.subr.mxu1 %v685_v16  ;;  %v673_v0 = vld [vmem:[%s1655_s3 + $0x180] sm:$0xff] }
  0x38   : > { %988 = vmatpush3.msra.mxu0 %v637_v17  ;;  %1026 = vmatpush3.msra.mxu1 %v669_v18  ;;  %v625_v1 = vld [vmem:[%s1655_s3] sm:$0xff] }
  0x39   : > { %989 = vmatprep.subr.mxu0 %v652_v19  ;;  %1027 = vmatprep.subr.mxu1 %v684_v20  ;;  %v657_v2 = vld [vmem:[%s1655_s3 + $0x100] sm:$0xff] }
  0x3a   : > { %990 = vmatpush3.msra.mxu0 %v636_v21  ;;  %1028 = vmatpush3.msra.mxu1 %v668_v22  ;;  %v375_v7 = vld [vmem:[%s1654_s2] sm:$0xf] }
  0x3b   : > { %991 = vmatprep.subr.mxu0 %v651_v23  ;;  %1029 = vmatprep.subr.mxu1 %v683_v24  ;;  %v380_v10 = vrot.slane %v375_v7, %v379_v5  ;;  %v388_v11 = vrot.slane %v375_v7, %v387_v6  ;;  %v384_v12 = vrot.slane %v375_v7, %v383_v8 }
  0x3c   : > { %992 = vmatpush3.msra.mxu0 %v635_v25  ;;  %1030 = vmatpush3.msra.mxu1 %v667_v26  ;;  %v392_v13 = vrot.slane %v375_v7, %v391_v9 }
  0x3d   : > { %993 = vmatprep.subr.mxu0 %v650_v27  ;;  %1031 = vmatprep.subr.mxu1 %v682_v28 }
  0x3e   : > { %994 = vmatpush3.msra.mxu0 %v634_v29  ;;  %1032 = vmatpush3.msra.mxu1 %v666_v30 }
  0x3f   : > { %995 = vmatprep.subr.mxu0 %v649_v31  ;;  %1033 = vmatprep.subr.mxu1 %v681_v32 }
  0x40   : > { %996 = vmatpush3.msra.mxu0 %v633_v33  ;;  %1034 = vmatpush3.msra.mxu1 %v665_v34 }
  0x41   : > { %997 = vmatprep.subr.mxu0 %v648_v35  ;;  %1035 = vmatprep.subr.mxu1 %v680_v36 }
  0x42   : > { %998 = vmatpush3.msra.mxu0 %v632_v37  ;;  %1036 = vmatpush3.msra.mxu1 %v664_v38 }
  0x43   : > { %999 = vmatprep.subr.mxu0 %v647_v39  ;;  %1037 = vmatprep.subr.mxu1 %v679_v40 }
  0x44   : > { %1000 = vmatpush3.msra.mxu0 %v631_v41  ;;  %1038 = vmatpush3.msra.mxu1 %v663_v42 }
  0x45   : > { %1001 = vmatprep.subr.mxu0 %v646_v43  ;;  %1039 = vmatprep.subr.mxu1 %v678_v44 }
  0x46   : > { %1002 = vmatpush3.msra.mxu0 %v630_v45  ;;  %1040 = vmatpush3.msra.mxu1 %v662_v46 }
  0x47   : > { %1003 = vmatprep.subr.mxu0 %v645_v47  ;;  %1041 = vmatprep.subr.mxu1 %v677_v48 }
  0x48   : > { %1004 = vmatpush3.msra.mxu0 %v629_v49  ;;  %1042 = vmatpush3.msra.mxu1 %v661_v50 }
  0x49   : > { %1005 = vmatprep.subr.mxu0 %v644_v51  ;;  %1043 = vmatprep.subr.mxu1 %v676_v52 }
  0x4a   : > { %1006 = vmatpush3.msra.mxu0 %v628_v53  ;;  %1044 = vmatpush3.msra.mxu1 %v660_v54 }
  0x4b   : > { %1007 = vmatprep.subr.mxu0 %v643_v55  ;;  %1045 = vmatprep.subr.mxu1 %v675_v56 }
  0x4c   : > { %1008 = vmatpush3.msra.mxu0 %v627_v57  ;;  %1046 = vmatpush3.msra.mxu1 %v659_v58 }
  0x4d   : > { %1009 = vmatprep.subr.mxu0 %v642_v59  ;;  %1047 = vmatprep.subr.mxu1 %v674_v60 }
  0x4e   : > { %1010 = vmatpush3.msra.mxu0 %v626_v61  ;;  %1048 = vmatpush3.msra.mxu1 %v658_v62 }
  0x4f   : > { %1011 = vmatprep.subr.mxu0 %v641_v63  ;;  %1049 = vmatprep.subr.mxu1 %v673_v0 }
  0x50   : > { %1012 = vmatpush3.msra.mxu0 %v625_v1  ;;  %1050 = vmatpush3.msra.mxu1 %v657_v2 }
  0xee   : > { %v463_v14 = vpop.f32.mrf.mxu0  ;;  %v540_v15 = vpop.f32.mrf.mxu1 }
  0xef   : > { %v1579_v16 = vadd.f32 %v463_v14, %v380_v10  ;;  %v1581_v17 = vadd.f32 %v540_v15, %v388_v11 }
  0xf0   : > { %v465_v18 = vpop.f32.mrf.mxu0  ;;  %v542_v19 = vpop.f32.mrf.mxu1 }
  0xf1   : > { %v551_v20 = vmul.f32 %v1579_v16, %v1579_v16  ;;  %v553_v21 = vmul.f32 %v1581_v17, %v1581_v17  ;;  %v1587_v22 = vadd.f32 %v465_v18, %v384_v12  ;;  %v1589_v23 = vadd.f32 %v542_v19, %v392_v13 }
  0xf2   : > { %v469_v24 = vpop.f32.mrf.mxu0  ;;  %v546_v25 = vpop.f32.mrf.mxu1 }
  0xf3   : > { %v559_v26 = vmul.f32 %v551_v20, %v1579_v16  ;;  %v561_v27 = vmul.f32 %v553_v21, %v1581_v17  ;;  %v552_v28 = vmul.f32 %v1587_v22, %v1587_v22  ;;  %v554_v29 = vmul.f32 %v1589_v23, %v1589_v23 }
  0xf4   : > { %v1597_v30 = vadd.f32 %v469_v24, %v380_v10  ;;  %v1599_v31 = vadd.f32 %v546_v25, %v388_v11  ;;  %v471_v32 = vpop.f32.mrf.mxu0  ;;  %v548_v33 = vpop.f32.mrf.mxu1 }
  0xf5   : > { %v567_v34 = vmul.f32 0.044715, %v559_v26  ;;  %v569_v35 = vmul.f32 0.044715, %v561_v27  ;;  %v560_v36 = vmul.f32 %v552_v28, %v1587_v22  ;;  %v562_v37 = vmul.f32 %v554_v29, %v1589_v23 }
  0xf6   : > { %v555_v38 = vmul.f32 %v1597_v30, %v1597_v30  ;;  %v557_v39 = vmul.f32 %v1599_v31, %v1599_v31  ;;  %v1607_v40 = vadd.f32 %v471_v32, %v384_v12  ;;  %v1609_v41 = vadd.f32 %v548_v33, %v392_v13 }
  0xf7   : > { %v575_v42 = vadd.f32 %v567_v34, %v1579_v16  ;;  %v577_v43 = vadd.f32 %v569_v35, %v1581_v17  ;;  %v568_v44 = vmul.f32 0.044715, %v560_v36  ;;  %v570_v45 = vmul.f32 0.044715, %v562_v37 }
  0xf8   : > { %v563_v46 = vmul.f32 %v555_v38, %v1597_v30  ;;  %v565_v47 = vmul.f32 %v557_v39, %v1599_v31  ;;  %v556_v48 = vmul.f32 %v1607_v40, %v1607_v40  ;;  %v558_v49 = vmul.f32 %v1609_v41, %v1609_v41 }
  0xf9   : > { %v583_v50 = vmul.f32 0.7978846, %v575_v42  ;;  %v585_v51 = vmul.f32 0.7978846, %v577_v43  ;;  %v576_v52 = vadd.f32 %v568_v44, %v1587_v22  ;;  %v578_v53 = vadd.f32 %v570_v45, %v1589_v23 }
  0xfa   : > { %v571_v54 = vmul.f32 0.044715, %v563_v46  ;;  %v573_v55 = vmul.f32 0.044715, %v565_v47  ;;  %v564_v56 = vmul.f32 %v556_v48, %v1607_v40  ;;  %v566_v57 = vmul.f32 %v558_v49, %v1609_v41 }
  0xfb   : > { %1082 = vtanh.f32 %v583_v50  ;;  %v584_v58 = vmul.f32 0.7978846, %v576_v52  ;;  %v586_v59 = vmul.f32 0.7978846, %v578_v53 }
  0xfc   : > { %1084 = vtanh.f32 %v585_v51  ;;  %v579_v60 = vadd.f32 %v571_v54, %v1597_v30  ;;  %v581_v61 = vadd.f32 %v573_v55, %v1599_v31  ;;  %v572_v62 = vmul.f32 0.044715, %v564_v56 }
  0xfd   : > { %1086 = vtanh.f32 %v584_v58  ;;  %v574_v63 = vmul.f32 0.044715, %v566_v57 }
  0xfe   : > { %1088 = vtanh.f32 %v586_v59  ;;  %v587_v0 = vmul.f32 0.7978846, %v579_v60  ;;  %v589_v1 = vmul.f32 0.7978846, %v581_v61  ;;  %v580_v2 = vadd.f32 %v572_v62, %v1607_v40 }
  0xff   : > { %v582_v3 = vadd.f32 %v574_v63, %v1609_v41 }
 0x100   : > { %1090 = vtanh.f32 %v587_v0  ;;  %v588_v4 = vmul.f32 0.7978846, %v580_v2 }
 0x101   : > { %1092 = vtanh.f32 %v589_v1  ;;  %v590_v5 = vmul.f32 0.7978846, %v582_v3 }
 0x102   : > { %1094 = vtanh.f32 %v588_v4 }
 0x103   : > { %1096 = vtanh.f32 %v590_v5 }
 0x108   : > { %v1083_v6 = vpop.eup %1082 }
 0x109   : > { %v1085_v7 = vpop.eup %1084  ;;  %v599_v8 = vadd.f32 1.0, %v1083_v6 }
 0x10a   : > { %v1087_v9 = vpop.eup %1086  ;;  %v601_v10 = vadd.f32 1.0, %v1085_v7 }
 0x10b   : > { %v1089_v11 = vpop.eup %1088  ;;  %v600_v12 = vadd.f32 1.0, %v1087_v9  ;;  %v607_v13 = vmul.f32 0.5, %v599_v8 }
 0x10c   : > { %v602_v14 = vadd.f32 1.0, %v1089_v11  ;;  %v609_v18 = vmul.f32 0.5, %v601_v10 }
 0x10d   : > { %v1091_v15 = vpop.eup %1090  ;;  %v608_v19 = vmul.f32 0.5, %v600_v12  ;;  %v615_v29 = vmul.f32 %v607_v13, %v1579_v16 }
 0x10e   : > { %v1093_v20 = vpop.eup %1092  ;;  %v610_v21 = vmul.f32 0.5, %v602_v14  ;;  %v603_v24 = vadd.f32 1.0, %v1091_v15  ;;  %v617_v34 = vmul.f32 %v609_v18, %v1581_v17 }
 0x10f   : > { %v1095_v25 = vpop.eup %1094  ;;  %v616_v26 = vmul.f32 %v608_v19, %v1587_v22  ;;  %v605_v27 = vadd.f32 1.0, %v1093_v20 }
 0x110   : > { %v1097_v28 = vpop.eup %1096  ;;  %v618_v32 = vmul.f32 %v610_v21, %v1589_v23  ;;  %v604_v33 = vadd.f32 1.0, %v1095_v25  ;;  %v611_v36 = vmul.f32 0.5, %v603_v24 }
 0x111   : > { %753 = vmatprep.mubr.f32.mxu0 %v616_v26  ;;  %v606_v35 = vadd.f32 1.0, %v1097_v28  ;;  %v613_v38 = vmul.f32 0.5, %v605_v27 }
 0x112   : > { %828 = vmatprep.mubr.f32.mxu1 %v618_v32  ;;  %754 = vmatmul.mubr.f32.vlgmr.msra.gmra.mxu0 %v615_v29  ;;  %v612_v37 = vmul.f32 0.5, %v604_v33  ;;  %v619_v16 = vmul.f32 %v611_v36, %v1597_v30 }
 0x113   : > { %829 = vmatmul.mubr.f32.vlgmr.msra.gmra.mxu1 %v617_v34  ;;  %v614_v39 = vmul.f32 0.5, %v606_v35  ;;  %v621_v23 = vmul.f32 %v613_v38, %v1599_v31 }
 0x114   : > { %v620_v22 = vmul.f32 %v612_v37, %v1607_v40  ;;  %v978_v40 = vld [vmem:[%s1656_s4] ss:$0 sm:$0xff] }
 0x115   : > { %v622_v42 = vmul.f32 %v614_v39, %v1609_v41 }
 0x116   : > { %758 = vmatprep.mubr.f32.mxu0 %v620_v22 }
 0x117   : > { %833 = vmatprep.mubr.f32.mxu1 %v622_v42  ;;  %759 = vmatmul.mubr.f32.gmra.mxu0 %v619_v16 }
 0x118   : > { %834 = vmatmul.mubr.f32.gmra.mxu1 %v621_v23 }
 0x1d2   : > { %v1013_v17 = vpop.f32.mrf.mxu0 }
 0x1d3   : > { %v1051_v43 = vpop.f32.mrf.mxu1 }
 0x1d4   : > { %v1014_v44 = vpop.f32.mrf.mxu0 }
 0x1d5   : > { %v1015_v45 = vadd.f32 %v1014_v44, %v1013_v17  ;;  %v1052_v46 = vpop.f32.mrf.mxu1 }
 0x1d6   : > { %v1053_v47 = vadd.f32 %v1052_v46, %v1051_v43 }
 0x1d7   : > { %v1016_v41 = vpop.f32.mrf.mxu0 }
 0x1d8   : > { %v831_v48 = vadd.f32 %v1053_v47, %v1015_v45  ;;  %v1054_v30 = vpop.f32.mrf.mxu1 }
 0x1d9   : > { %v1017_v31 = vpop.f32.mrf.mxu0 }
 0x1da   : > { %v855_v49 = vadd.f32 %v978_v40, %v831_v48  ;;  %v1018_v50 = vadd.f32 %v1017_v31, %v1016_v41  ;;  %v1055_v51 = vpop.f32.mrf.mxu1 }
 0x1db   : > { %v1056_v52 = vadd.f32 %v1055_v51, %v1054_v30 }
 0x1dc   : > { %857 = vst [vmem:[%s301_s24] sm:$0xff] %v855_v49 }
 0x1dd   : > { %v836_v53 = vadd.f32 %v1056_v52, %v1018_v50 }
 0x1df   : > { %v856_v54 = vadd.f32 %v978_v40, %v836_v53 }
 0x1e1   : > { %858 = vst [vmem:[%s301_s24 + $0x8] sm:$0xff] %v856_v54 }
 0x1e2 PF: > { %s15_s20 = sadd.s32 1, %s1120_s20   ;;  %s1659_s18 = smov %s1116_s19 }
 0x1e3   : > { %p12_p5 = scmp.ge.s32.totalorder %s15_s20, 4   ;;  %s1660_s19 = smov %s1662_s21 }
 0x1e5   :  { %14 = sbr.rel (!%p12_p5) target bundleno = 2 (0x2), region = 87 }

</bundles_post_ra>
